<compile_context>
chip_gen: v7x
topology: tpu7x:2x2x1
jax: 0.10.0
libtpu: 0.0.40
codegen_flags: <defaults>
</compile_context>

<pallas_src>
import functools

import jax
import jax.numpy as jnp
from jax.experimental import pallas as pl
from jax.experimental.pallas import tpu as pltpu

_LANES = 128
_MAX_TILE_ROWS = 2048  # 2048 * 128 * 4B = 1 MiB per input per pipeline buffer


def _hinge_loss_kernel(pos_ref, neg_ref, out_ref, acc_ref, *, margin, inv_n):
    step = pl.program_id(0)

    @pl.when(step == 0)
    def _():
        acc_ref[0] = 0.0

    # Load narrow (possibly bf16), compute in f32 on the VPU.
    pos = pos_ref[...].astype(jnp.float32)
    neg = neg_ref[...].astype(jnp.float32)

    # margin_ranking_loss with target = +1: max(0, margin - (pos - neg))
    elem = jnp.maximum(margin - (pos - neg), 0.0)

    # Single fused reduction per tile; scale by 1/N only at finalize.
    acc_ref[0] += jnp.sum(elem)

    @pl.when(step == pl.num_programs(0) - 1)
    def _():
        out_ref[0] = acc_ref[0] * inv_n


def _cdiv(a, b):
    return -(-a // b)


def _round_up(a, b):
    return _cdiv(a, b) * b


def hinge_loss(pos_score, neg_score, *, margin=1.0, weight=None):
    """Pallas TPU implementation of HingeLoss.forward (weight=None path)."""
    # TODO(synk): the `weight is not None` branch (elementwise weight * per-element
    # loss, then mean) is not wired up; the default-constructed module uses None.
    assert weight is None, "weight tensor path not implemented"

    pos = jnp.ravel(pos_score)
    neg = jnp.ravel(neg_score)
    n = pos.shape[0]

    rows = _cdiv(n, _LANES)
    if rows <= _MAX_TILE_ROWS:
        tile_rows = _round_up(max(rows, 1), 8)
        grid_n = 1
    else:
        tile_rows = _MAX_TILE_ROWS
        grid_n = _cdiv(rows, tile_rows)
    padded_rows = grid_n * tile_rows
    padded_n = padded_rows * _LANES

    # Pad so padded elements contribute exactly zero:
    #   max(0, margin - (margin - 0)) == 0
    pad = padded_n - n
    pos = jnp.pad(pos, (0, pad), constant_values=float(margin))
    neg = jnp.pad(neg, (0, pad), constant_values=0.0)

    pos2 = pos.reshape(padded_rows, _LANES)
    neg2 = neg.reshape(padded_rows, _LANES)

    kernel = functools.partial(
        _hinge_loss_kernel, margin=float(margin), inv_n=1.0 / float(n))

    out = pl.pallas_call(
        kernel,
        out_shape=jax.ShapeDtypeStruct((1,), jnp.float32),
        grid=(grid_n,),
        in_specs=[
            pl.BlockSpec((tile_rows, _LANES), lambda i: (i, 0)),
            pl.BlockSpec((tile_rows, _LANES), lambda i: (i, 0)),
        ],
        out_specs=pl.BlockSpec(memory_space=pltpu.MemorySpace.SMEM),
        scratch_shapes=[pltpu.SMEM((1,), jnp.float32)],
        compiler_params=pltpu.CompilerParams(
            dimension_semantics=("arbitrary",)),
    )(pos2, neg2)
    return out[0]


def _reference(pos, neg, margin=1.0):
    # F.margin_ranking_loss(pos, neg, target=1, margin=margin, reduction='mean')
    return jnp.mean(jnp.maximum(margin - (pos - neg), 0.0))


if __name__ == "__main__":
    key = jax.random.PRNGKey(0)
    k_pos, k_neg = jax.random.split(key, 2)

    # Small 1-D score vectors, consistent with the module's forward().
    # N deliberately not a multiple of 128 to exercise the zero-contribution padding.
    N = 1000
    margin = 1.0

    pos_score = jax.random.normal(k_pos, (N,), dtype=jnp.float32)
    neg_score = jax.random.normal(k_neg, (N,), dtype=jnp.float32)

    loss = hinge_loss(pos_score, neg_score, margin=margin)
    loss = jax.block_until_ready(loss)

    ref = _reference(pos_score.astype(jnp.float32),
                     neg_score.astype(jnp.float32), margin=margin)
    assert jnp.allclose(loss, ref, atol=1e-6, rtol=1e-6), (loss, ref)

    print("KERNEL_OK")
</pallas_src>

<mosaic_0001>
module attributes {stable_mosaic.version = 11 : i64} {
  func.func @_hinge_loss_kernel(%arg0: i32, %arg1: memref<8x128xf32, #tpu.memory_space<vmem>>, %arg2: memref<8x128xf32, #tpu.memory_space<vmem>>, %arg3: memref<1xf32, #tpu.memory_space<smem>>, %arg4: memref<1xf32, #tpu.memory_space<smem>>) attributes {dimension_semantics = [#tpu.dimension_semantics<arbitrary>], iteration_bounds = array<i64: 1>, scalar_prefetch = 0 : i64, scratch_operands = 1 : i64, tpu.core_type = #tpu.core_type<tc>, window_params = [{transform_indices = @transform_0, window_bounds = array<i64: 8, 128>}, {transform_indices = @transform_1, window_bounds = array<i64: 8, 128>}, {transform_indices = @transform_2, window_bounds = array<i64: 1>}]} {
    %c0_i32 = arith.constant 0 : i32
    %0 = arith.cmpi eq, %arg0, %c0_i32 : i32
    %1 = arith.extui %0 : i1 to i32
    %c0_i32_0 = arith.constant 0 : i32
    %2 = arith.cmpi ne, %1, %c0_i32_0 : i32
    scf.if %2 {
      %cst_10 = arith.constant 0.000000e+00 : f32
      %c0_11 = arith.constant 0 : index
      %20 = memref.load %arg4[%c0_11] : memref<1xf32, #tpu.memory_space<smem>>
      memref.store %cst_10, %arg4[%c0_11] : memref<1xf32, #tpu.memory_space<smem>>
    } else {
    }
    %c0 = arith.constant 0 : index
    %c0_1 = arith.constant 0 : index
    %3 = vector.load %arg1[%c0, %c0_1] : memref<8x128xf32, #tpu.memory_space<vmem>>, vector<8x128xf32>
    %c0_2 = arith.constant 0 : index
    %c0_3 = arith.constant 0 : index
    %4 = vector.load %arg2[%c0_2, %c0_3] : memref<8x128xf32, #tpu.memory_space<vmem>>, vector<8x128xf32>
    %5 = arith.subf %3, %4 : vector<8x128xf32>
    %cst = arith.constant 1.000000e+00 : f32
    %6 = vector.broadcast %cst : f32 to vector<8x128xf32>
    %7 = arith.subf %6, %5 : vector<8x128xf32>
    %cst_4 = arith.constant 0.000000e+00 : f32
    %8 = vector.broadcast %cst_4 : f32 to vector<8x128xf32>
    %9 = arith.maximumf %7, %8 : vector<8x128xf32>
    %c0_5 = arith.constant 0 : index
    %10 = memref.load %arg4[%c0_5] : memref<1xf32, #tpu.memory_space<smem>>
    %11 = vector.shape_cast %9 : vector<8x128xf32> to vector<1x8x128xf32>
    %cst_6 = arith.constant dense<0.000000e+00> : vector<1xf32>
    %12 = vector.multi_reduction <add>, %11, %cst_6 [1, 2] : vector<1x8x128xf32> to vector<1xf32>
    %13 = vector.shape_cast %12 : vector<1xf32> to vector<1x1x1xf32>
    %14 = vector.extract %13[0, 0, 0] : f32 from vector<1x1x1xf32>
    %15 = arith.addf %10, %14 : f32
    %c0_7 = arith.constant 0 : index
    %16 = memref.load %arg4[%c0_7] : memref<1xf32, #tpu.memory_space<smem>>
    memref.store %15, %arg4[%c0_7] : memref<1xf32, #tpu.memory_space<smem>>
    %c0_i32_8 = arith.constant 0 : i32
    %17 = arith.cmpi eq, %arg0, %c0_i32_8 : i32
    %18 = arith.extui %17 : i1 to i32
    %c0_i32_9 = arith.constant 0 : i32
    %19 = arith.cmpi ne, %18, %c0_i32_9 : i32
    scf.if %19 {
      %c0_10 = arith.constant 0 : index
      %20 = memref.load %arg4[%c0_10] : memref<1xf32, #tpu.memory_space<smem>>
      %cst_11 = arith.constant 1.000000e-03 : f32
      %21 = arith.mulf %20, %cst_11 : f32
      %c0_12 = arith.constant 0 : index
      %22 = memref.load %arg3[%c0_12] : memref<1xf32, #tpu.memory_space<smem>>
      memref.store %21, %arg3[%c0_12] : memref<1xf32, #tpu.memory_space<smem>>
    } else {
    }
    return
  }
  func.func @transform_0(%arg0: i32) -> (i32, i32) {
    %c0_i32 = arith.constant 0 : i32
    %c0_i32_0 = arith.constant 0 : i32
    return %arg0, %c0_i32 : i32, i32
  }
  func.func @transform_1(%arg0: i32) -> (i32, i32) {
    %c0_i32 = arith.constant 0 : i32
    %c0_i32_0 = arith.constant 0 : i32
    return %arg0, %c0_i32 : i32, i32
  }
  func.func @transform_2(%arg0: i32) -> i32 {
    %c0_i32 = arith.constant 0 : i32
    %c0_i32_0 = arith.constant 0 : i32
    return %c0_i32 : i32
  }
}

</mosaic_0001>

<bundles_post_ra>
// kernel: tpu_custom_call.1
= control target key start
LH: loop header
LB: loop body
LE: loop exit
PB: predicated region body
PF: predicated region fallthrough
CT: control target
= control target key end

     0   :  { %7 = vsyncpa [#allocation4], 0  ;;  %s201_s0 = inlined_call_operand.hbm [shape: f32[8,128], index: 0, kind: input, shape index: {}]   ;;  %s202_s1 = inlined_call_operand.hbm [shape: f32[8,128], index: 1, kind: input, shape index: {}]   ;;  %s203_s2 = inlined_call_operand.hbm [shape: f32[1], index: 2, kind: output, shape index: {}]  }
   0x1   :  { %8 = vsyncpa [#allocation7], 0 }
   0x2   :  { %9 = vsyncpa [#allocation5], 0  ;;  %s147_s9 = smov [#allocation3]   ;;  %s148_s11 = smov [#allocation6]  }
   0x3   :  { %s16_s10 = sshll.u32 %s147_s9, 4  ;;  %s26_s12 = sshll.u32 %s148_s11, 4  ;;  %s17_s10 = int_to_ptr.vmem [resolvable:$true] %s16_s10  ;;  %s27_s12 = int_to_ptr.vmem [resolvable:$true] %s26_s12 }
   0x4   :  { %s87_s15 = scalar_lea.hbm %s201_s0, 128 }
   0x5   :  { %p88_p0 = scmp.ne.s32.totalorder %s201_s0, %s87_s15  ;;  %p91_p1 = scmp.lt.u32.totalorder %s87_s15, %s201_s0 }
   0x7   :  { %p93_p2 = pnand %p91_p1, %p88_p0 }
   0x9   :  { %96 = shalt.err (!%p93_p2)
}
   0xa   :  { %s97_s20 = scalar_lea.vmem %s17_s10, 128  ;;  %p102_p4 = scmp.lt.s32.totalorder %s17_s10, %s17_s10 }
   0xb   :  { %p98_p3 = scmp.ne.s32.totalorder %s17_s10, %s97_s20  ;;  %p103_p5 = scmp.lt.s32.totalorder %s97_s20, %s97_s20 }
   0xd   :  { %p104_p6 = por %p103_p5, %p102_p4 }
   0xf   :  { %p105_p7 = pnand %p104_p6, %p98_p3 }
  0x11   :  { %108 = shalt.err (!%p105_p7)
}
  0x12   :  { %19 = dma.hbm_to_vmem [thread:$0]  %s201_s0, 128, %s17_s10, [#allocation4]  }
  0x13   :  { %s109_s25 = scalar_lea.hbm %s202_s1, 128 }
  0x14   :  { %p110_p8 = scmp.ne.s32.totalorder %s202_s1, %s109_s25  ;;  %p113_p9 = scmp.lt.u32.totalorder %s109_s25, %s202_s1 }
  0x16   :  { %p115_p10 = pnand %p113_p9, %p110_p8 }
  0x18   :  { %118 = shalt.err (!%p115_p10)
}
  0x19   :  { %s119_s30 = scalar_lea.vmem %s27_s12, 128  ;;  %p124_p12 = scmp.lt.s32.totalorder %s27_s12, %s27_s12 }
  0x1a   :  { %p120_p11 = scmp.ne.s32.totalorder %s27_s12, %s119_s30  ;;  %p125_p13 = scmp.lt.s32.totalorder %s119_s30, %s119_s30 }
  0x1c   :  { %p126_p0 = por %p125_p13, %p124_p12 }
  0x1e   :  { %p127_p1 = pnand %p126_p0, %p120_p11 }
  0x20   :  { %130 = shalt.err (!%p127_p1)
}
  0x21   :  { %29 = dma.hbm_to_vmem [thread:$0]  %s202_s1, 128, %s27_s12, [#allocation7]  }
  0x22   :  { %141 = dma.done.wait [#allocation4], 128  }
  0x23   :  { %142 = vsyncadd [#allocation4], 4294967168 }
  0x24   :  { %143 = dma.done.wait [#allocation7], 128  }
  0x25   :  { %144 = vsyncadd [#allocation7], 4294967168  ;;  %v42_v0 = vld [vmem:[#allocation3] sm:$0xff]  ;;  %v43_v1 = vld [vmem:[#allocation6] sm:$0xff]  ;;  %s131_s7 = scalar_lea.hbm %s203_s2, 16 }
  0x26   :  { %v44_v2 = vsub.f32 %v42_v0, %v43_v1  ;;  %p132_p2 = scmp.ne.s32.totalorder %s203_s2, %s131_s7  ;;  %p135_p3 = scmp.lt.u32.totalorder %s131_s7, %s203_s2 }
  0x28   :  { %v45_v3 = vsub.f32 1.0, %v44_v2  ;;  %p137_p4 = pnand %p135_p3, %p132_p2 }
  0x2a   :  { %v46_v4 = vmax.f32 %v45_v3, 0.0 }
  0x2c   :  { %48 = vadd.xlane.f32.xlu0 %v46_v4 }
  0xb9   :  { %v49_v5 = vpop.xlane.xlu0 %48 }
  0xba   :  { %v50_v6 = vrot.slane %v49_v5, 4 }
  0xbc   :  { %v51_v7 = vadd.f32 %v50_v6, %v49_v5 }
  0xbe   :  { %v52_v8 = vrot.slane %v51_v7, 2 }
  0xc0   :  { %v53_v9 = vadd.f32 %v52_v8, %v51_v7 }
  0xc2   :  { %v54_v10 = vrot.slane %v53_v9, 1 }
  0xc4   :  { %v55_v11 = vadd.f32 %v54_v10, %v53_v9 }
  0xc6   :  { %82 = vpush %v55_v11 }
  0xf7   :  { %s83_s4 = spop %82 }
  0xf8   :  { %s64_s1 = smul.f32 0.001, %s83_s4 }
  0xfa   :  { %66 = sst [smem:[#allocation8]] %s64_s1 }
  0xfb   :  { %140 = shalt.err (!%p137_p4)
}
  0xfc   :  { %s149_s12 = smov [#allocation8]  }
  0xfd   :  { %74 = dma.smem_to_hbm %s149_s12, 16, %s203_s2, [#allocation5]  }
  0xfe   :  { %145 = dma.done.wait [#allocation5], 16  }
  0xff   :  { %146 = vsyncadd [#allocation5], 4294967280 }
 0x100   :  { %78 = sfence }
 0x101   :  { %79 = vsyncpa [#allocation4], 1 }
 0x102   :  { %80 = vsyncpa [#allocation7], 1 }
 0x103   :  { %81 = vsyncpa [#allocation5], 1 }

</bundles_post_ra>
